<compile_context>
chip_gen: v5e
topology: v5e:2x2
jax: 0.10.0
libtpu: 0.0.40
codegen_flags: <defaults>
</compile_context>

<pallas_src>
import jax
import jax.numpy as jnp
from jax.experimental import pallas as pl
from jax.experimental.pallas import tpu as pltpu

IN_FEATURES = 10
OUT_FEATURES = 10

_TB_MAX = 8192                 # max rows per grid step (compile-time constant per shape)
_TB_ALIGN = 512                # tile granularity (multiple of 128 lanes)
_SMALL_BATCH_THRESHOLD = 4096  # below this, plain fused XLA beats custom-call overhead


def _linear_relu_norm_kernel(x_ref, w_ref, b_ref, o_ref):
    # x_ref: (TB, IN)  f32  -- batch rows of this tile (ragged tail rows are garbage)
    # w_ref: (OUT, IN) f32  -- PyTorch layout, VMEM-resident across grid steps
    # b_ref: (OUT, 1)  f32  -- VMEM-resident
    # o_ref: (1, TB)   f32  -- lane-dense row of per-row L2 norms
    x = x_ref[...]
    w = w_ref[...]
    b = b_ref[...]

    # Lane-dense formulation: batch on lanes, features on sublanes.
    # One in-kernel transpose per tile (XLU slot has slack; no extra HBM pass).
    xt = jnp.transpose(x)                                   # (IN, TB)

    # Linear (x @ W.T + b) as 10 broadcast multiply-adds on the VPU, all in f32.
    # yt[j, i] = b[j] + sum_k w[j, k] * x[i, k]
    yt = b + w[:, 0:1] * xt[0:1, :]                         # (OUT, TB)
    for k in range(1, IN_FEATURES):
        yt = yt + w[:, k:k + 1] * xt[k:k + 1, :]

    # ReLU, square, reduce over the feature (sublane) axis, sqrt on the dense row.
    yt = jnp.maximum(yt, 0.0)
    ss = jnp.sum(yt * yt, axis=0, keepdims=True)            # (1, TB)
    o_ref[...] = jnp.sqrt(ss)


def _reference(x, weight, bias):
    y = jnp.maximum(x @ weight.T + bias, 0.0)
    return jnp.sqrt(jnp.sum(y * y, axis=1))


def _round_up(a, m):
    return ((a + m - 1) // m) * m


def _pick_tile(batch):
    # Keep >= 2 grid steps for medium batches so the "parallel" batch axis really
    # splits across both v7x TensorCores; cap at _TB_MAX; multiple of _TB_ALIGN.
    half = _round_up(max(1, pl.cdiv(batch, 2)), _TB_ALIGN)
    return max(_TB_ALIGN, min(_TB_MAX, half))


def linear_relu_norm(x, weight, bias, *, force_pallas=False):
    """x: (B, 10) f32; weight: (10, 10) f32 PyTorch layout (out, in); bias: (10,) f32."""
    batch = x.shape[0]

    # Small-batch fast path: custom-call + pipeline prologue dominates; let XLA fuse.
    if batch < _SMALL_BATCH_THRESHOLD and not force_pallas:
        return _reference(x, weight, bias)

    tb = _pick_tile(batch)
    num_tiles = pl.cdiv(batch, tb)
    padded = num_tiles * tb

    b_col = bias.reshape(OUT_FEATURES, 1)   # glue, not hot path

    cost = pl.CostEstimate(
        flops=batch * (2 * IN_FEATURES * OUT_FEATURES + 3 * OUT_FEATURES),
        transcendentals=padded,  # one sqrt per (padded) row
        bytes_accessed=(batch * IN_FEATURES * 4
                        + IN_FEATURES * OUT_FEATURES * 4
                        + OUT_FEATURES * 4
                        + padded * 4),
    )

    out = pl.pallas_call(
        _linear_relu_norm_kernel,
        out_shape=jax.ShapeDtypeStruct((1, padded), jnp.float32),
        grid=(num_tiles,),
        in_specs=[
            # x: tiled over batch; last block may be ragged (OOB rows unspecified, sliced off).
            pl.BlockSpec((tb, IN_FEATURES), lambda i: (i, 0)),
            # W, b: constant index_map -> stay VMEM-resident across grid steps.
            pl.BlockSpec((OUT_FEATURES, IN_FEATURES), lambda i: (0, 0)),
            pl.BlockSpec((OUT_FEATURES, 1), lambda i: (0, 0)),
        ],
        # Lane-dense output blocks: full 128-lane stores, dense writeback DMA.
        out_specs=pl.BlockSpec((1, tb), lambda i: (0, i)),
        compiler_params=pltpu.CompilerParams(
            dimension_semantics=("parallel",),   # megacore split on v7x; no-op on v5e/v6e
            vmem_limit_bytes=32 * 1024 * 1024,
        ),
        cost_estimate=cost,
    )(x, weight, b_col)

    # Lanes >= batch in the ragged last tile hold unspecified values: slice them off
    # here and never consume them downstream.
    return out[0, :batch]   # (B,) matches torch.linalg.norm(..., dim=1)


if __name__ == "__main__":
    key = jax.random.PRNGKey(0)
    kx, kw, kb, kx2 = jax.random.split(key, 4)

    # Deterministic parameters (PyTorch Linear default: U(-1/sqrt(in), 1/sqrt(in))).
    bound = 1.0 / jnp.sqrt(jnp.float32(IN_FEATURES))
    weight = jax.random.uniform(
        kw, (OUT_FEATURES, IN_FEATURES), dtype=jnp.float32, minval=-bound, maxval=bound
    )
    bias = jax.random.uniform(
        kb, (OUT_FEATURES,), dtype=jnp.float32, minval=-bound, maxval=bound
    )

    # 1) Nominal module shape (batch=2): jnp fast path.
    batch_small = 2
    x_small = jax.random.normal(kx, (batch_small, IN_FEATURES), dtype=jnp.float32)
    ref_small = _reference(x_small, weight, bias)
    out_small = jax.block_until_ready(linear_relu_norm(x_small, weight, bias))
    assert out_small.shape == (batch_small,)
    assert jnp.allclose(out_small, ref_small, rtol=1e-5, atol=1e-5)

    # 2) Same batch forced through the Pallas kernel (single ragged tile, padded lanes sliced).
    out_small_pk = jax.block_until_ready(
        linear_relu_norm(x_small, weight, bias, force_pallas=True)
    )
    assert out_small_pk.shape == (batch_small,)
    assert jnp.allclose(out_small_pk, ref_small, rtol=1e-5, atol=1e-5)

    # 3) Multi-tile, non-multiple-of-tile batch: pipelined path, ragged tail, no pad copy.
    batch_big = 2 * _TB_MAX + 37
    x_big = jax.random.normal(kx2, (batch_big, IN_FEATURES), dtype=jnp.float32)
    ref_big = _reference(x_big, weight, bias)
    out_big = jax.block_until_ready(linear_relu_norm(x_big, weight, bias))
    assert out_big.shape == (batch_big,)
    assert jnp.allclose(out_big, ref_big, rtol=1e-5, atol=1e-5)

    print("KERNEL_OK")
</pallas_src>

<mosaic_0001>
module attributes {stable_mosaic.version = 11 : i64} {
  func.func @_linear_relu_norm_kernel(%arg0: i32, %arg1: memref<512x10xf32, #tpu.memory_space<vmem>>, %arg2: memref<10x10xf32, #tpu.memory_space<vmem>>, %arg3: memref<10x1xf32, #tpu.memory_space<vmem>>, %arg4: memref<1x512xf32, #tpu.memory_space<vmem>>) attributes {dimension_semantics = [#tpu.dimension_semantics<parallel>], iteration_bounds = array<i64: 1>, scalar_prefetch = 0 : i64, scratch_operands = 0 : i64, tpu.core_type = #tpu.core_type<tc>, window_params = [{transform_indices = @transform_0, window_bounds = array<i64: 512, 10>}, {pipeline_mode = #tpu.pipeline_mode<synchronous>, transform_indices = @transform_1, window_bounds = array<i64: 10, 10>}, {pipeline_mode = #tpu.pipeline_mode<synchronous>, transform_indices = @transform_2, window_bounds = array<i64: 10, 1>}, {transform_indices = @transform_3, window_bounds = array<i64: 1, 512>}]} {
    %c0 = arith.constant 0 : index
    %c0_0 = arith.constant 0 : index
    %0 = vector.load %arg1[%c0, %c0_0] : memref<512x10xf32, #tpu.memory_space<vmem>>, vector<512x10xf32>
    %c0_1 = arith.constant 0 : index
    %c0_2 = arith.constant 0 : index
    %1 = vector.load %arg2[%c0_1, %c0_2] : memref<10x10xf32, #tpu.memory_space<vmem>>, vector<10x10xf32>
    %c0_3 = arith.constant 0 : index
    %c0_4 = arith.constant 0 : index
    %2 = vector.load %arg3[%c0_3, %c0_4] : memref<10x1xf32, #tpu.memory_space<vmem>>, vector<10x1xf32>
    %3 = tpu.transpose %0, [1, 0] : vector<512x10xf32> -> vector<10x512xf32>
    %4 = vector.extract_strided_slice %1 {offsets = [0, 0], sizes = [10, 1], strides = [1, 1]} : vector<10x10xf32> to vector<10x1xf32>
    %5 = vector.extract_strided_slice %3 {offsets = [0, 0], sizes = [1, 512], strides = [1, 1]} : vector<10x512xf32> to vector<1x512xf32>
    %6 = vector.broadcast %4 : vector<10x1xf32> to vector<10x512xf32>
    %7 = vector.broadcast %5 : vector<1x512xf32> to vector<10x512xf32>
    %8 = arith.mulf %6, %7 : vector<10x512xf32>
    %9 = vector.broadcast %2 : vector<10x1xf32> to vector<10x512xf32>
    %10 = arith.addf %9, %8 : vector<10x512xf32>
    %11 = vector.extract_strided_slice %1 {offsets = [0, 1], sizes = [10, 1], strides = [1, 1]} : vector<10x10xf32> to vector<10x1xf32>
    %12 = vector.extract_strided_slice %3 {offsets = [1, 0], sizes = [1, 512], strides = [1, 1]} : vector<10x512xf32> to vector<1x512xf32>
    %13 = vector.broadcast %11 : vector<10x1xf32> to vector<10x512xf32>
    %14 = vector.broadcast %12 : vector<1x512xf32> to vector<10x512xf32>
    %15 = arith.mulf %13, %14 : vector<10x512xf32>
    %16 = arith.addf %10, %15 : vector<10x512xf32>
    %17 = vector.extract_strided_slice %1 {offsets = [0, 2], sizes = [10, 1], strides = [1, 1]} : vector<10x10xf32> to vector<10x1xf32>
    %18 = vector.extract_strided_slice %3 {offsets = [2, 0], sizes = [1, 512], strides = [1, 1]} : vector<10x512xf32> to vector<1x512xf32>
    %19 = vector.broadcast %17 : vector<10x1xf32> to vector<10x512xf32>
    %20 = vector.broadcast %18 : vector<1x512xf32> to vector<10x512xf32>
    %21 = arith.mulf %19, %20 : vector<10x512xf32>
    %22 = arith.addf %16, %21 : vector<10x512xf32>
    %23 = vector.extract_strided_slice %1 {offsets = [0, 3], sizes = [10, 1], strides = [1, 1]} : vector<10x10xf32> to vector<10x1xf32>
    %24 = vector.extract_strided_slice %3 {offsets = [3, 0], sizes = [1, 512], strides = [1, 1]} : vector<10x512xf32> to vector<1x512xf32>
    %25 = vector.broadcast %23 : vector<10x1xf32> to vector<10x512xf32>
    %26 = vector.broadcast %24 : vector<1x512xf32> to vector<10x512xf32>
    %27 = arith.mulf %25, %26 : vector<10x512xf32>
    %28 = arith.addf %22, %27 : vector<10x512xf32>
    %29 = vector.extract_strided_slice %1 {offsets = [0, 4], sizes = [10, 1], strides = [1, 1]} : vector<10x10xf32> to vector<10x1xf32>
    %30 = vector.extract_strided_slice %3 {offsets = [4, 0], sizes = [1, 512], strides = [1, 1]} : vector<10x512xf32> to vector<1x512xf32>
    %31 = vector.broadcast %29 : vector<10x1xf32> to vector<10x512xf32>
    %32 = vector.broadcast %30 : vector<1x512xf32> to vector<10x512xf32>
    %33 = arith.mulf %31, %32 : vector<10x512xf32>
    %34 = arith.addf %28, %33 : vector<10x512xf32>
    %35 = vector.extract_strided_slice %1 {offsets = [0, 5], sizes = [10, 1], strides = [1, 1]} : vector<10x10xf32> to vector<10x1xf32>
    %36 = vector.extract_strided_slice %3 {offsets = [5, 0], sizes = [1, 512], strides = [1, 1]} : vector<10x512xf32> to vector<1x512xf32>
    %37 = vector.broadcast %35 : vector<10x1xf32> to vector<10x512xf32>
    %38 = vector.broadcast %36 : vector<1x512xf32> to vector<10x512xf32>
    %39 = arith.mulf %37, %38 : vector<10x512xf32>
    %40 = arith.addf %34, %39 : vector<10x512xf32>
    %41 = vector.extract_strided_slice %1 {offsets = [0, 6], sizes = [10, 1], strides = [1, 1]} : vector<10x10xf32> to vector<10x1xf32>
    %42 = vector.extract_strided_slice %3 {offsets = [6, 0], sizes = [1, 512], strides = [1, 1]} : vector<10x512xf32> to vector<1x512xf32>
    %43 = vector.broadcast %41 : vector<10x1xf32> to vector<10x512xf32>
    %44 = vector.broadcast %42 : vector<1x512xf32> to vector<10x512xf32>
    %45 = arith.mulf %43, %44 : vector<10x512xf32>
    %46 = arith.addf %40, %45 : vector<10x512xf32>
    %47 = vector.extract_strided_slice %1 {offsets = [0, 7], sizes = [10, 1], strides = [1, 1]} : vector<10x10xf32> to vector<10x1xf32>
    %48 = vector.extract_strided_slice %3 {offsets = [7, 0], sizes = [1, 512], strides = [1, 1]} : vector<10x512xf32> to vector<1x512xf32>
    %49 = vector.broadcast %47 : vector<10x1xf32> to vector<10x512xf32>
    %50 = vector.broadcast %48 : vector<1x512xf32> to vector<10x512xf32>
    %51 = arith.mulf %49, %50 : vector<10x512xf32>
    %52 = arith.addf %46, %51 : vector<10x512xf32>
    %53 = vector.extract_strided_slice %1 {offsets = [0, 8], sizes = [10, 1], strides = [1, 1]} : vector<10x10xf32> to vector<10x1xf32>
    %54 = vector.extract_strided_slice %3 {offsets = [8, 0], sizes = [1, 512], strides = [1, 1]} : vector<10x512xf32> to vector<1x512xf32>
    %55 = vector.broadcast %53 : vector<10x1xf32> to vector<10x512xf32>
    %56 = vector.broadcast %54 : vector<1x512xf32> to vector<10x512xf32>
    %57 = arith.mulf %55, %56 : vector<10x512xf32>
    %58 = arith.addf %52, %57 : vector<10x512xf32>
    %59 = vector.extract_strided_slice %1 {offsets = [0, 9], sizes = [10, 1], strides = [1, 1]} : vector<10x10xf32> to vector<10x1xf32>
    %60 = vector.extract_strided_slice %3 {offsets = [9, 0], sizes = [1, 512], strides = [1, 1]} : vector<10x512xf32> to vector<1x512xf32>
    %61 = vector.broadcast %59 : vector<10x1xf32> to vector<10x512xf32>
    %62 = vector.broadcast %60 : vector<1x512xf32> to vector<10x512xf32>
    %63 = arith.mulf %61, %62 : vector<10x512xf32>
    %64 = arith.addf %58, %63 : vector<10x512xf32>
    %cst = arith.constant 0.000000e+00 : f32
    %65 = vector.broadcast %cst : f32 to vector<10x512xf32>
    %66 = arith.maximumf %64, %65 : vector<10x512xf32>
    %67 = arith.mulf %66, %66 : vector<10x512xf32>
    %cst_5 = arith.constant dense<0.000000e+00> : vector<512xf32>
    %68 = vector.multi_reduction <add>, %67, %cst_5 [0] : vector<10x512xf32> to vector<512xf32>
    %69 = vector.shape_cast %68 : vector<512xf32> to vector<1x512xf32>
    %70 = math.sqrt %69 : vector<1x512xf32>
    %c0_6 = arith.constant 0 : index
    %c0_7 = arith.constant 0 : index
    %71 = vector.load %arg4[%c0_6, %c0_7] : memref<1x512xf32, #tpu.memory_space<vmem>>, vector<1x512xf32>
    tpu.vector_store %arg4[%c0_6, %c0_7], %70 {strides = array<i32>} : memref<1x512xf32, #tpu.memory_space<vmem>>, vector<1x512xf32>,
    return
  }
  func.func @transform_0(%arg0: i32) -> (i32, i32) {
    %c0_i32 = arith.constant 0 : i32
    %c0_i32_0 = arith.constant 0 : i32
    return %arg0, %c0_i32 : i32, i32
  }
  func.func @transform_1(%arg0: i32) -> (i32, i32) {
    %c0_i32 = arith.constant 0 : i32
    %c0_i32_0 = arith.constant 0 : i32
    %c0_i32_1 = arith.constant 0 : i32
    return %c0_i32, %c0_i32_0 : i32, i32
  }
  func.func @transform_2(%arg0: i32) -> (i32, i32) {
    %c0_i32 = arith.constant 0 : i32
    %c0_i32_0 = arith.constant 0 : i32
    %c0_i32_1 = arith.constant 0 : i32
    return %c0_i32, %c0_i32_0 : i32, i32
  }
  func.func @transform_3(%arg0: i32) -> (i32, i32) {
    %c0_i32 = arith.constant 0 : i32
    %c0_i32_0 = arith.constant 0 : i32
    return %c0_i32, %arg0 : i32, i32
  }
}

</mosaic_0001>

<bundles_post_ra>
// kernel: tpu_custom_call.1
= control target key start
LH: loop header
LB: loop body
LE: loop exit
PB: predicated region body
PF: predicated region fallthrough
CT: control target
= control target key end

     0   :  { %8 = vsyncpa [#allocation3], 0  ;;  %s1072_s0 = inlined_call_operand.hbm [shape: f32[2,10], index: 0, kind: input, shape index: {}]   ;;  %s1073_s1 = inlined_call_operand.vmem [shape: f32[10,10], index: 1, kind: input, shape index: {}]   ;;  %s1074_s2 = inlined_call_operand.vmem [shape: f32[10,1], index: 2, kind: input, shape index: {}]   ;;  %s1075_s3 = inlined_call_operand.hbm [shape: f32[1,512], index: 3, kind: output, shape index: {}]  }
   0x1   :  { %9 = vsyncpa [#allocation4], 0 }
   0x2   :  { %13 = vsyncadd [#allocation3], 8160  ;;  %s14_s14 = sshll.u32 %s1072_s0, 4  ;;  %s746_s15 = smov [#allocation2]   ;;  %s15_s14 = int_to_ptr.hbm [resolvable:$true] %s14_s14 }
   0x3   :  { %s16_s16 = sshll.u32 %s746_s15, 4  ;;  %s747_s17 = smov 32   ;;  %s17_s16 = int_to_ptr.vmem [resolvable:$true] %s16_s16 }
   0x4   :  { %s748_s18 = smov 2  }
   0x5   :  { %22 = dma.hbm_to_vmem [thread:$0]  %s15_s14, 32, %s17_s16, [#allocation3], %s747_s17, %s747_s17, %s748_s18  }
   0x6   :  { %742 = dma.done.wait [#allocation3], 8192  }
   0x7   :  { %743 = vsyncadd [#allocation3], 4294959104  ;;  %v63_v0 = vld [vmem:[#allocation2 + $0x100] sm:$0xff]  ;;  %v64_v3 = vld [vmem:[#allocation2 + $0x108] sm:$0xff]  ;;  %v749_v58 = vmov 0   ;;  %vm535_vm0 = vcmask 1041408  }
   0x8   :  { %v47_v1 = vld [vmem:[#allocation2 + $0x80] sm:$0xff]  ;;  %163 = vxpose.xlu2.b32.start [1/16] (narrow) %v63_v0, 16  ;;  %v48_v4 = vld [vmem:[#allocation2 + $0x88] sm:$0xff]  ;;  %v65_v6 = vld [vmem:[#allocation2 + $0x110] sm:$0xff]  ;;  %vm623_vm1 = vcmask 1040384   ;;  %vm625_vm10 = vcmask 1042434  }
   0x9   :  { %v31_v2 = vld [vmem:[#allocation2] sm:$0xff]  ;;  %131 = vxpose.xlu1.b32.start [1/16] (narrow) %v47_v1, 16  ;;  %v32_v5 = vld [vmem:[#allocation2 + $0x8] sm:$0xff]  ;;  %v49_v7 = vld [vmem:[#allocation2 + $0x90] sm:$0xff]  ;;  %s641_s28 = sshll.u32 %s1075_s3, 4  ;;  %s642_s28 = int_to_ptr.hbm [resolvable:$true] %s641_s28 }
   0xa   :  { %99 = vxpose.xlu0.b32.start [1/16] (narrow) %v31_v2, 16  ;;  %v33_v8 = vld [vmem:[#allocation2 + $0x10] sm:$0xff]  ;;  %v66_v9 = vld [vmem:[#allocation2 + $0x118] sm:$0xff]  ;;  %v67_v12 = vld [vmem:[#allocation2 + $0x120] sm:$0xff] }
   0xb   :  { %v50_v10 = vld [vmem:[#allocation2 + $0x98] sm:$0xff]  ;;  %v51_v13 = vld [vmem:[#allocation2 + $0xa0] sm:$0xff]  ;;  %v68_v15 = vld [vmem:[#allocation2 + $0x128] sm:$0xff] }
   0xc   :  { %v34_v11 = vld [vmem:[#allocation2 + $0x18] sm:$0xff]  ;;  %v35_v14 = vld [vmem:[#allocation2 + $0x20] sm:$0xff]  ;;  %v52_v16 = vld [vmem:[#allocation2 + $0xa8] sm:$0xff] }
   0xd   :  { %v36_v17 = vld [vmem:[#allocation2 + $0x28] sm:$0xff]  ;;  %v69_v18 = vld [vmem:[#allocation2 + $0x130] sm:$0xff]  ;;  %v70_v21 = vld [vmem:[#allocation2 + $0x138] sm:$0xff] }
   0xe   :  { %v53_v19 = vld [vmem:[#allocation2 + $0xb0] sm:$0xff]  ;;  %v54_v22 = vld [vmem:[#allocation2 + $0xb8] sm:$0xff]  ;;  %v71_v24 = vld [vmem:[#allocation2 + $0x140] sm:$0xff] }
   0xf   :  { %v37_v20 = vld [vmem:[#allocation2 + $0x30] sm:$0xff]  ;;  %v38_v23 = vld [vmem:[#allocation2 + $0x38] sm:$0xff]  ;;  %v55_v25 = vld [vmem:[#allocation2 + $0xc0] sm:$0xff] }
  0x10   :  { %164 = vxpose.xlu2.b32.cont [2/16] (narrow) %v64_v3, 16  ;;  %v39_v26 = vld [vmem:[#allocation2 + $0x40] sm:$0xff]  ;;  %v72_v27 = vld [vmem:[#allocation2 + $0x148] sm:$0xff]  ;;  %v73_v30 = vld [vmem:[#allocation2 + $0x150] sm:$0xff]  ;;  %v750_v3 = vmov 1  }
  0x11   :  { %132 = vxpose.xlu1.b32.cont [2/16] (narrow) %v48_v4, 16  ;;  %v56_v28 = vld [vmem:[#allocation2 + $0xc8] sm:$0xff]  ;;  %v57_v31 = vld [vmem:[#allocation2 + $0xd0] sm:$0xff]  ;;  %v74_v33 = vld [vmem:[#allocation2 + $0x158] sm:$0xff] }
  0x12   :  { %100 = vxpose.xlu0.b32.cont [2/16] (narrow) %v32_v5, 16  ;;  %v40_v29 = vld [vmem:[#allocation2 + $0x48] sm:$0xff]  ;;  %v41_v32 = vld [vmem:[#allocation2 + $0x50] sm:$0xff]  ;;  %v58_v34 = vld [vmem:[#allocation2 + $0xd8] sm:$0xff]  ;;  %v751_v5 = vmov 2  }
  0x13   :  { %v42_v35 = vld [vmem:[#allocation2 + $0x58] sm:$0xff]  ;;  %v75_v36 = vld [vmem:[#allocation2 + $0x160] sm:$0xff]  ;;  %v76_v39 = vld [vmem:[#allocation2 + $0x168] sm:$0xff] }
  0x14   :  { %v59_v37 = vld [vmem:[#allocation2 + $0xe0] sm:$0xff]  ;;  %v60_v40 = vld [vmem:[#allocation2 + $0xe8] sm:$0xff]  ;;  %v77_v42 = vld [vmem:[#allocation2 + $0x170] sm:$0xff] }
  0x15   :  { %v43_v38 = vld [vmem:[#allocation2 + $0x60] sm:$0xff]  ;;  %v44_v41 = vld [vmem:[#allocation2 + $0x68] sm:$0xff]  ;;  %v61_v43 = vld [vmem:[#allocation2 + $0xf0] sm:$0xff] }
  0x16   :  { %v45_v44 = vld [vmem:[#allocation2 + $0x70] sm:$0xff]  ;;  %v78_v45 = vld [vmem:[#allocation2 + $0x178] sm:$0xff]  ;;  %v79_v48 = vld [vmem:[#allocation2 + $0x180] sm:$0xff] }
  0x17   :  { %v62_v46 = vld [vmem:[#allocation2 + $0xf8] sm:$0xff]  ;;  %v80_v49 = vld [vmem:[#allocation2 + $0x188] sm:$0xff]  ;;  %v81_v50 = vld [vmem:[#allocation2 + $0x190] sm:$0xff] }
  0x18   :  { %165 = vxpose.xlu2.b32.cont [3/16] (narrow) %v65_v6, 16  ;;  %v46_v47 = vld [vmem:[#allocation2 + $0x78] sm:$0xff]  ;;  %v83_v52 = vld [vmem:[#allocation2 + $0x1a0] sm:$0xff]  ;;  %v84_v53 = vld [vmem:[#allocation2 + $0x1a8] sm:$0xff] }
  0x19   :  { %133 = vxpose.xlu1.b32.cont [3/16] (narrow) %v49_v7, 16  ;;  %v82_v51 = vld [vmem:[#allocation2 + $0x198] sm:$0xff]  ;;  %v85_v54 = vld [vmem:[#allocation2 + $0x1b0] sm:$0xff]  ;;  %v87_v56 = vld [vmem:[#allocation2 + $0x1c0] sm:$0xff]  ;;  %v752_v7 = vmov 3  }
  0x1a   :  { %101 = vxpose.xlu0.b32.cont [3/16] (narrow) %v33_v8, 16  ;;  %v86_v55 = vld [vmem:[#allocation2 + $0x1b8] sm:$0xff]  ;;  %v88_v57 = vld [vmem:[#allocation2 + $0x1c8] sm:$0xff]  ;;  %v89_v59 = vld [vmem:[#allocation2 + $0x1d0] sm:$0xff]  ;;  %v753_v8 = vmov 4  }
  0x1b   :  { %v95_v60 = vld [vmem:[%s1073_s1] sm:$0xff]  ;;  %v90_v61 = vld [vmem:[#allocation2 + $0x1d8] sm:$0xff]  ;;  %v96_v0 = vld [vmem:[%s1073_s1 + $0x8] sm:$0x3]  ;;  %s759_s1 = smov [#allocation5]  }
  0x1c   :  { %v97_v62 = vld [vmem:[%s1074_s2] sm:$0xff]  ;;  %v98_v1 = vld [vmem:[%s1074_s2 + $0x8] sm:$0x3]  ;;  %v93_v4 = vld [vmem:[#allocation2 + $0x1f0] sm:$0xff]  ;;  %s639_s2 = sshll.u32 %s759_s1, 4  ;;  %s640_s2 = int_to_ptr.vmem [resolvable:$true] %s639_s2 }
  0x1d   :  { %v91_v63 = vld [vmem:[#allocation2 + $0x1e0] sm:$0xff]  ;;  %v92_v2 = vld [vmem:[#allocation2 + $0x1e8] sm:$0xff]  ;;  %v94_v6 = vld [vmem:[#allocation2 + $0x1f8] sm:$0xff] }
  0x20   :  { %166 = vxpose.xlu2.b32.cont [4/16] (narrow) %v66_v9, 16  ;;  %v754_v9 = vmov 5  }
  0x21   :  { %134 = vxpose.xlu1.b32.cont [4/16] (narrow) %v50_v10, 16  ;;  %v755_v10 = vmov 6  }
  0x22   :  { %102 = vxpose.xlu0.b32.cont [4/16] (narrow) %v34_v11, 16  ;;  %v756_v11 = vmov 7  }
  0x28   :  { %167 = vxpose.xlu2.b32.cont [5/16] (narrow) %v67_v12, 16  ;;  %v757_v12 = vmov 8  }
  0x29   :  { %135 = vxpose.xlu1.b32.cont [5/16] (narrow) %v51_v13, 16  ;;  %v758_v13 = vmov 9  }
  0x2a   :  { %103 = vxpose.xlu0.b32.cont [5/16] (narrow) %v35_v14, 16 }
  0x30   :  { %168 = vxpose.xlu2.b32.cont [6/16] (narrow) %v68_v15, 16 }
  0x31   :  { %136 = vxpose.xlu1.b32.cont [6/16] (narrow) %v52_v16, 16 }
  0x32   :  { %104 = vxpose.xlu0.b32.cont [6/16] (narrow) %v36_v17, 16 }
  0x38   :  { %169 = vxpose.xlu2.b32.cont [7/16] (narrow) %v69_v18, 16 }
  0x39   :  { %137 = vxpose.xlu1.b32.cont [7/16] (narrow) %v53_v19, 16 }
  0x3a   :  { %105 = vxpose.xlu0.b32.cont [7/16] (narrow) %v37_v20, 16 }
  0x40   :  { %170 = vxpose.xlu2.b32.cont [8/16] (narrow) %v70_v21, 16 }
  0x41   :  { %138 = vxpose.xlu1.b32.cont [8/16] (narrow) %v54_v22, 16 }
  0x42   :  { %106 = vxpose.xlu0.b32.cont [8/16] (narrow) %v38_v23, 16 }
  0x48   :  { %171 = vxpose.xlu2.b32.cont [9/16] (narrow) %v71_v24, 16 }
  0x49   :  { %139 = vxpose.xlu1.b32.cont [9/16] (narrow) %v55_v25, 16 }
  0x4a   :  { %107 = vxpose.xlu0.b32.cont [9/16] (narrow) %v39_v26, 16 }
  0x50   :  { %172 = vxpose.xlu2.b32.cont [10/16] (narrow) %v72_v27, 16 }
  0x51   :  { %140 = vxpose.xlu1.b32.cont [10/16] (narrow) %v56_v28, 16 }
  0x52   :  { %108 = vxpose.xlu0.b32.cont [10/16] (narrow) %v40_v29, 16 }
  0x58   :  { %173 = vxpose.xlu2.b32.cont [11/16] (narrow) %v73_v30, 16 }
  0x59   :  { %141 = vxpose.xlu1.b32.cont [11/16] (narrow) %v57_v31, 16 }
  0x5a   :  { %109 = vxpose.xlu0.b32.cont [11/16] (narrow) %v41_v32, 16 }
  0x60   :  { %174 = vxpose.xlu2.b32.cont [12/16] (narrow) %v74_v33, 16 }
  0x61   :  { %142 = vxpose.xlu1.b32.cont [12/16] (narrow) %v58_v34, 16 }
  0x62   :  { %110 = vxpose.xlu0.b32.cont [12/16] (narrow) %v42_v35, 16 }
  0x68   :  { %175 = vxpose.xlu2.b32.cont [13/16] (narrow) %v75_v36, 16 }
  0x69   :  { %143 = vxpose.xlu1.b32.cont [13/16] (narrow) %v59_v37, 16 }
  0x6a   :  { %111 = vxpose.xlu0.b32.cont [13/16] (narrow) %v43_v38, 16 }
  0x70   :  { %176 = vxpose.xlu2.b32.cont [14/16] (narrow) %v76_v39, 16 }
  0x71   :  { %144 = vxpose.xlu1.b32.cont [14/16] (narrow) %v60_v40, 16 }
  0x72   :  { %112 = vxpose.xlu0.b32.cont [14/16] (narrow) %v44_v41, 16 }
  0x78   :  { %177 = vxpose.xlu2.b32.cont [15/16] (narrow) %v77_v42, 16 }
  0x79   :  { %145 = vxpose.xlu1.b32.cont [15/16] (narrow) %v61_v43, 16 }
  0x7a   :  { %113 = vxpose.xlu0.b32.cont [15/16] (narrow) %v45_v44, 16 }
  0x80   :  { %178 = vxpose.xlu2.b32.end [16/16] (narrow) %v78_v45, 16 }
  0x81   :  { %146 = vxpose.xlu1.b32.end [16/16] (narrow) %v62_v46, 16 }
  0x82   :  { %114 = vxpose.xlu0.b32.end [16/16] (narrow) %v46_v47, 16 }
  0x8a   :  { %195 = vxpose.xlu0.b32.start [1/16] (narrow) %v79_v48, 16 }
  0x92   :  { %196 = vxpose.xlu0.b32.cont [2/16] (narrow) %v80_v49, 16 }
  0x9a   :  { %197 = vxpose.xlu0.b32.cont [3/16] (narrow) %v81_v50, 16 }
  0xa1   :  { %v797_v15 = vpop.trf.xlu2 }
  0xa2   :  { %198 = vxpose.xlu0.b32.cont [4/16] (narrow) %v82_v51, 16  ;;  %v239_v31 = vperm.slane %v797_v15, 0  ;;  %v277_v39 = vperm.slane %v797_v15, 1  ;;  %v305_v45 = vperm.slane %v797_v15, 2 }
  0xa9   :  { %v801_v17 = vpop.trf.xlu2 }
  0xaa   :  { %199 = vxpose.xlu0.b32.cont [5/16] (narrow) %v83_v52, 16 }
  0xad   :  { %v795_v14 = vpop.trf.xlu1 }
  0xae   :  { %v809_v24 = vpop.trf.xlu0  ;;  %v238_v32 = vperm.slane %v795_v14, 0  ;;  %v276_v40 = vperm.slane %v795_v14, 1  ;;  %v304_v46 = vperm.slane %v795_v14, 2 }
  0xaf   :  { %v237_v34 = vperm.slane %v809_v24, 0  ;;  %v275_v42 = vperm.slane %v809_v24, 1  ;;  %v303_v52 = vperm.slane %v809_v24, 2 }
  0xb2   :  { %200 = vxpose.xlu0.b32.cont [6/16] (narrow) %v84_v53, 16 }
  0xb5   :  { %v799_v16 = vpop.trf.xlu1 }
  0xb6   :  { %v815_v27 = vpop.trf.xlu0 }
  0xba   :  { %201 = vxpose.xlu0.b32.cont [7/16] (narrow) %v85_v54, 16 }
  0xc2   :  { %202 = vxpose.xlu0.b32.cont [8/16] (narrow) %v86_v55, 16 }
  0xca   :  { %203 = vxpose.xlu0.b32.cont [9/16] (narrow) %v87_v56, 16 }
  0xd2   :  { %204 = vxpose.xlu0.b32.cont [10/16] (narrow) %v88_v57, 16 }
  0xd4   :  { %665 = vset.pattern.permute.xlu1 %v749_v58 }
  0xda   :  { %205 = vxpose.xlu0.b32.cont [11/16] (narrow) %v89_v59, 16 }
  0xdb   :  { %229 = vperm.xlu1 %665, %v95_v60  }
  0xe2   :  { %206 = vxpose.xlu0.b32.cont [12/16] (narrow) %v90_v61, 16  ;;  %666 = vset.pattern.permute.xlu2 %v749_v58  ;;  %v333_v58 = vperm.slane %v797_v15, 3 }
  0xe3   :  { %251 = vperm.xlu1 %665, %v97_v62  }
  0xe9   :  { %234 = vperm.xlu2 %666, %v96_v0  }
  0xea   :  { %207 = vxpose.xlu0.b32.cont [13/16] (narrow) %v91_v63, 16 }
  0xeb   :  { %256 = vperm.xlu1 %665, %v98_v1   ;;  %v331_v1 = vperm.slane %v809_v24, 3 }
  0xf1   :  { %667 = vset.pattern.permute.xlu2 %v750_v3 }
  0xf2   :  { %208 = vxpose.xlu0.b32.cont [14/16] (narrow) %v92_v2, 16  ;;  %268 = vperm.xlu2 %667, %v95_v60  }
  0xf3   :  { %668 = vset.pattern.permute.xlu1 %v750_v3 }
  0xf4   :  { %272 = vperm.xlu1 %668, %v96_v0  }
  0xfa   :  { %209 = vxpose.xlu0.b32.cont [15/16] (narrow) %v93_v4, 16  ;;  %669 = vset.pattern.permute.xlu2 %v751_v5 }
  0xfb   :  { %300 = vperm.xlu2 %669, %v96_v0  }
  0xfc   :  { %670 = vset.pattern.permute.xlu1 %v751_v5 }
  0xfd   :  { %296 = vperm.xlu1 %670, %v95_v60  }
 0x102   :  { %210 = vxpose.xlu0.b32.end [16/16] (narrow) %v94_v6, 16 }
 0x103   :  { %671 = vset.pattern.permute.xlu2 %v752_v7 }
 0x104   :  { %328 = vperm.xlu2 %671, %v96_v0  }
 0x105   :  { %672 = vset.pattern.permute.xlu1 %v752_v7  ;;  %v473_v7 = vperm.slane %v801_v17, 0 }
 0x106   :  { %324 = vperm.xlu1 %672, %v95_v60  }
 0x10c   :  { %674 = vset.pattern.permute.xlu2 %v753_v8 }
 0x10d   :  { %352 = vperm.xlu2 %674, %v95_v60  }
 0x10e   :  { %675 = vset.pattern.permute.xlu1 %v754_v9 }
 0x10f   :  { %384 = vperm.xlu1 %675, %v96_v0  }
 0x115   :  { %676 = vset.pattern.permute.xlu2 %v754_v9 }
 0x116   :  { %380 = vperm.xlu2 %676, %v95_v60  }
 0x117   :  { %677 = vset.pattern.permute.xlu1 %v755_v10 }
 0x118   :  { %412 = vperm.xlu1 %677, %v96_v0  }
 0x11e   :  { %678 = vset.pattern.permute.xlu2 %v755_v10  ;;  %v1078_v10 = vperm.slane %v795_v14, 4 }
 0x11f   :  { %408 = vperm.xlu2 %678, %v95_v60  }
 0x120   :  { %679 = vset.pattern.permute.xlu1 %v756_v11 }
 0x121   :  { %440 = vperm.xlu1 %679, %v96_v0  }
 0x127   :  { %680 = vset.pattern.permute.xlu2 %v756_v11 }
 0x128   :  { %436 = vperm.xlu2 %680, %v95_v60  }
 0x129   :  { %681 = vset.pattern.permute.xlu1 %v757_v12 }
 0x12a   :  { %468 = vperm.xlu1 %681, %v96_v0  }
 0x12e   :  { %v819_v30 = vpop.trf.xlu0 }
 0x12f   :  { %v240_v36 = vperm.slane %v819_v30, 0  ;;  %v278_v44 = vperm.slane %v819_v30, 1  ;;  %v306_v57 = vperm.slane %v819_v30, 2  ;;  %v334_v6 = vperm.slane %v819_v30, 3 }
 0x130   :  { %682 = vset.pattern.permute.xlu2 %v757_v12 }
 0x131   :  { %464 = vperm.xlu2 %682, %v95_v60  }
 0x132   :  { %683 = vset.pattern.permute.xlu1 %v758_v13 }
 0x133   :  { %496 = vperm.xlu1 %683, %v96_v0  }
 0x139   :  { %684 = vset.pattern.permute.xlu2 %v758_v13 }
 0x13a   :  { %492 = vperm.xlu2 %684, %v95_v60  }
 0x143   :  { %v803_v19 = vpop.permute.xlu2 %234 }
 0x144   :  { %v246_v9 = vmul.f32 %v238_v32, %v803_v19 }
 0x14c   :  { %v269_v21 = vpop.permute.xlu2 %268 }
 0x14d   :  { %v230_v18 = vpop.permute.xlu1 %229  ;;  %v280_v47 = vmul.f32 %v276_v40, %v269_v21  ;;  %v281_v48 = vmul.f32 %v277_v39, %v269_v21  ;;  %v279_v51 = vmul.f32 %v275_v42, %v269_v21  ;;  %v282_v56 = vmul.f32 %v278_v44, %v269_v21 }
 0x14e   :  { %v242_v37 = vmul.f32 %v238_v32, %v230_v18  ;;  %v243_v38 = vmul.f32 %v239_v31, %v230_v18  ;;  %v241_v41 = vmul.f32 %v237_v34, %v230_v18  ;;  %v244_v43 = vmul.f32 %v240_v36, %v230_v18 }
 0x14f   :  { %v359_v18 = vperm.slane %v809_v24, 4  ;;  %v247_v32 = vmul.f32 %v239_v31, %v803_v19 }
 0x155   :  { %v252_v20 = vpop.permute.xlu1 %251  ;;  %v807_v23 = vpop.permute.xlu2 %300 }
 0x156   :  { %v260_v49 = vadd.f32 %v252_v20, %v242_v37  ;;  %v261_v50 = vadd.f32 %v252_v20, %v243_v38  ;;  %v259_v53 = vadd.f32 %v252_v20, %v241_v41  ;;  %v262_v55 = vadd.f32 %v252_v20, %v244_v43 }
 0x157   :  { %v1076_v43 = vperm.slane %v819_v30, 4 }
 0x158   :  { %v288_v59 = vadd.f32 %v280_v47, %v260_v49  ;;  %v289_v60 = vadd.f32 %v281_v48, %v261_v50  ;;  %v287_v2 = vadd.f32 %v279_v51, %v259_v53  ;;  %v290_v4 = vadd.f32 %v282_v56, %v262_v55 }
 0x159   :  { %v312_v47 = vmul.f32 %v304_v46, %v807_v23  ;;  %v389_v48 = vperm.slane %v797_v15, 5  ;;  %v388_v49 = vperm.slane %v795_v14, 5  ;;  %v417_v50 = vperm.slane %v797_v15, 6 }
 0x15a   :  { %v416_v51 = vperm.slane %v795_v14, 6  ;;  %v387_v53 = vperm.slane %v809_v24, 5 }
 0x15d   :  { %v805_v22 = vpop.permute.xlu1 %256 }
 0x15e   :  { %v813_v26 = vpop.permute.xlu2 %328 }
 0x166   :  { %v811_v25 = vpop.permute.xlu1 %272 }
 0x167   :  { %v817_v29 = vpop.permute.xlu2 %352 }
 0x169   :  { %673 = vset.pattern.permute.xlu0 %v753_v8  ;;  %v472_v8 = vperm.slane %v799_v16, 0 }
 0x16f   :  { %v297_v28 = vpop.permute.xlu1 %296 }
 0x170   :  { %356 = vperm.xlu0 %673, %v96_v0   ;;  %v824_v35 = vpop.permute.xlu2 %380  ;;  %v308_v61 = vmul.f32 %v304_v46, %v297_v28  ;;  %v309_v62 = vmul.f32 %v305_v45, %v297_v28  ;;  %v332_v0 = vperm.slane %v795_v14, 3  ;;  %v307_v3 = vmul.f32 %v303_v52, %v297_v28 }
 0x171   :  { %v310_v5 = vmul.f32 %v306_v57, %v297_v28 }
 0x172   :  { %v316_v11 = vadd.f32 %v308_v61, %v288_v59  ;;  %v317_v12 = vadd.f32 %v309_v62, %v289_v60  ;;  %v315_v28 = vadd.f32 %v307_v3, %v287_v2  ;;  %v363_v60 = vmul.f32 %v359_v18, %v817_v29 }
 0x173   :  { %v318_v38 = vadd.f32 %v310_v5, %v290_v4  ;;  %v264_v61 = vadd.f32 %v805_v22, %v246_v9  ;;  %v366_v3 = vmul.f32 %v1076_v43, %v817_v29  ;;  %v390_v4 = vperm.slane %v819_v30, 5 }
 0x174   :  { %v265_v5 = vadd.f32 %v805_v22, %v247_v32  ;;  %v248_v9 = vmul.f32 %v240_v36, %v803_v19  ;;  %v285_v43 = vmul.f32 %v277_v39, %v811_v25  ;;  %v286_v39 = vmul.f32 %v278_v44, %v811_v25 }
 0x175   :  { %v340_v44 = vmul.f32 %v332_v0, %v813_v26 }
 0x178   :  { %685 = vset.pattern.permute.xlu0 %v758_v13  ;;  %v325_v33 = vpop.permute.xlu1 %324  ;;  %v1077_v13 = vperm.slane %v797_v15, 4 }
 0x179   :  { %v852_v63 = vpop.permute.xlu2 %408  ;;  %v336_v20 = vmul.f32 %v332_v0, %v325_v33  ;;  %v337_v21 = vmul.f32 %v333_v58, %v325_v33  ;;  %v335_v37 = vmul.f32 %v331_v1, %v325_v33  ;;  %v338_v41 = vmul.f32 %v334_v6, %v325_v33 }
 0x17a   :  { %v365_v31 = vmul.f32 %v1077_v13, %v817_v29  ;;  %v364_v33 = vmul.f32 %v1078_v10, %v817_v29  ;;  %v392_v29 = vmul.f32 %v388_v49, %v824_v35 }
 0x17b   :  { %v344_v46 = vadd.f32 %v336_v20, %v316_v11  ;;  %v345_v56 = vadd.f32 %v337_v21, %v317_v12  ;;  %v343_v59 = vadd.f32 %v335_v37, %v315_v28  ;;  %v346_v2 = vadd.f32 %v338_v41, %v318_v38 }
 0x17c   :  { %v284_v11 = vmul.f32 %v276_v40, %v811_v25  ;;  %v245_v12 = vmul.f32 %v237_v34, %v803_v19  ;;  %v393_v20 = vmul.f32 %v389_v48, %v824_v35  ;;  %v445_v21 = vperm.slane %v797_v15, 7 }
 0x17d   :  { %v415_v40 = vperm.slane %v809_v24, 6  ;;  %v391_v34 = vmul.f32 %v387_v53, %v824_v35  ;;  %v371_v28 = vadd.f32 %v363_v60, %v343_v59  ;;  %v372_v37 = vadd.f32 %v364_v33, %v344_v46 }
 0x17e   :  { %v373_v32 = vadd.f32 %v365_v31, %v345_v56  ;;  %v443_v19 = vperm.slane %v809_v24, 7  ;;  %v374_v36 = vadd.f32 %v366_v3, %v346_v2  ;;  %v394_v38 = vmul.f32 %v390_v4, %v824_v35 }
 0x17f   :  { %v418_v41 = vperm.slane %v819_v30, 6  ;;  %v292_v13 = vadd.f32 %v284_v11, %v264_v61  ;;  %v263_v10 = vadd.f32 %v805_v22, %v245_v12  ;;  %v266_v59 = vadd.f32 %v805_v22, %v248_v9 }
 0x180   :  { %v420_v31 = vmul.f32 %v416_v51, %v852_v63  ;;  %v421_v33 = vmul.f32 %v417_v50, %v852_v63  ;;  %v283_v35 = vmul.f32 %v275_v42, %v811_v25  ;;  %v419_v22 = vmul.f32 %v415_v40, %v852_v63 }
 0x181   :  { %v844_v54 = vpop.permute.xlu1 %384  ;;  %v399_v46 = vadd.f32 %v391_v34, %v371_v28  ;;  %v400_v56 = vadd.f32 %v392_v29, %v372_v37  ;;  %v401_v60 = vadd.f32 %v393_v20, %v373_v32  ;;  %v444_v61 = vperm.slane %v795_v14, 7  ;;  %v958_v20 = vpop.trf.xlu0 }
 0x182   :  { %v437_v62 = vpop.permute.xlu2 %436  ;;  %v446_v3 = vperm.slane %v819_v30, 7  ;;  %v402_v11 = vadd.f32 %v394_v38, %v374_v36  ;;  %v422_v42 = vmul.f32 %v418_v41, %v852_v63  ;;  %v313_v25 = vmul.f32 %v305_v45, %v807_v23 }
 0x183   :  { %v293_v12 = vadd.f32 %v285_v43, %v265_v5  ;;  %v320_v9 = vadd.f32 %v312_v47, %v292_v13  ;;  %v291_v34 = vadd.f32 %v283_v35, %v263_v10  ;;  %v294_v28 = vadd.f32 %v286_v39, %v266_v59 }
 0x184   :  { %v311_v37 = vmul.f32 %v303_v52, %v807_v23  ;;  %v314_v63 = vmul.f32 %v306_v57, %v807_v23  ;;  %v447_v45 = vmul.f32 %v443_v19, %v437_v62  ;;  %v427_v32 = vadd.f32 %v419_v22, %v399_v46 }
 0x185   :  { %v428_v0 = vadd.f32 %v420_v31, %v400_v56  ;;  %v429_v43 = vadd.f32 %v421_v33, %v401_v60  ;;  %v448_v13 = vmul.f32 %v444_v61, %v437_v62  ;;  %v449_v10 = vmul.f32 %v445_v21, %v437_v62 }
 0x186   :  { %v450_v47 = vmul.f32 %v446_v3, %v437_v62  ;;  %v430_v52 = vadd.f32 %v422_v42, %v402_v11  ;;  %v341_v23 = vmul.f32 %v333_v58, %v813_v26  ;;  %v471_v57 = vperm.slane %v815_v27, 0 }
 0x187   :  { %v474_v5 = vperm.slane %v958_v20, 0  ;;  %v321_v36 = vadd.f32 %v313_v25, %v293_v12  ;;  %v319_v38 = vadd.f32 %v311_v37, %v291_v34  ;;  %v322_v59 = vadd.f32 %v314_v63, %v294_v28 }
 0x188   :  { %v339_v31 = vmul.f32 %v331_v1, %v813_v26  ;;  %v342_v62 = vmul.f32 %v334_v6, %v813_v26  ;;  %v501_v33 = vperm.slane %v801_v17, 1  ;;  %v500_v35 = vperm.slane %v799_v16, 1 }
 0x189   :  { %v499_v58 = vperm.slane %v815_v27, 1  ;;  %v348_v39 = vadd.f32 %v340_v44, %v320_v9  ;;  %v455_v22 = vadd.f32 %v447_v45, %v427_v32  ;;  %v456_v46 = vadd.f32 %v448_v13, %v428_v0 }
 0x18a   :  { %v883_v55 = vpop.permute.xlu1 %412  ;;  %v457_v56 = vadd.f32 %v449_v10, %v429_v43  ;;  %v458_v60 = vadd.f32 %v450_v47, %v430_v52  ;;  %v502_v25 = vperm.slane %v958_v20, 1  ;;  %v347_v44 = vadd.f32 %v339_v31, %v319_v38 }
 0x18b   :  { %v465_v29 = vpop.permute.xlu2 %464  ;;  %v349_v12 = vadd.f32 %v341_v23, %v321_v36  ;;  %v350_v9 = vadd.f32 %v342_v62, %v322_v59  ;;  %v395_v34 = vmul.f32 %v387_v53, %v844_v54  ;;  %v396_v28 = vmul.f32 %v388_v49, %v844_v54 }
 0x18c   :  { %v475_v11 = vmul.f32 %v471_v57, %v465_v29  ;;  %v476_v1 = vmul.f32 %v472_v8, %v465_v29  ;;  %v477_v26 = vmul.f32 %v473_v7, %v465_v29  ;;  %v478_v6 = vmul.f32 %v474_v5, %v465_v29 }
 0x18d   :  { %v397_v37 = vmul.f32 %v389_v48, %v844_v54  ;;  %v398_v29 = vmul.f32 %v390_v4, %v844_v54  ;;  %v423_v63 = vmul.f32 %v415_v40, %v883_v55  ;;  %v424_v53 = vmul.f32 %v416_v51, %v883_v55 }
 0x18e   :  { %v425_v49 = vmul.f32 %v417_v50, %v883_v55  ;;  %v426_v48 = vmul.f32 %v418_v41, %v883_v55  ;;  %v483_v32 = vadd.f32 %v475_v11, %v455_v22  ;;  %v484_v0 = vadd.f32 %v476_v1, %v456_v46 }
 0x18f   :  { %v485_v54 = vadd.f32 %v477_v26, %v457_v56  ;;  %v486_v4 = vadd.f32 %v478_v6, %v458_v60  ;;  %v1079_v13 = vperm.slane %v795_v14, 4  ;;  %v1080_v10 = vperm.slane %v797_v15, 4 }
 0x190   :  { %v1081_v50 = vperm.slane %v819_v30, 4 }
 0x193   :  { %v946_v2 = vpop.permute.xlu1 %440 }
 0x194   :  { %v493_v45 = vpop.permute.xlu2 %492  ;;  %v451_v62 = vmul.f32 %v443_v19, %v946_v2  ;;  %v452_v22 = vmul.f32 %v444_v61, %v946_v2  ;;  %v453_v46 = vmul.f32 %v445_v21, %v946_v2  ;;  %v454_v56 = vmul.f32 %v446_v3, %v946_v2 }
 0x195   :  { %v503_v55 = vmul.f32 %v499_v58, %v493_v45  ;;  %v504_v41 = vmul.f32 %v500_v35, %v493_v45  ;;  %v505_v23 = vmul.f32 %v501_v33, %v493_v45  ;;  %v506_v36 = vmul.f32 %v502_v25, %v493_v45 }
 0x197   :  { %v511_v26 = vadd.f32 %v503_v55, %v483_v32  ;;  %v512_v6 = vadd.f32 %v504_v41, %v484_v0  ;;  %v513_v24 = vadd.f32 %v505_v23, %v485_v54  ;;  %v514_v19 = vadd.f32 %v506_v36, %v486_v4 }
 0x199   :  { %v519_v32 = vmax.f32 %v511_v26, 0.0  ;;  %v520_v0 = vmax.f32 %v512_v6, 0.0  ;;  %v521_v54 = vmax.f32 %v513_v24, 0.0  ;;  %v522_v27 = vmax.f32 %v514_v19, 0.0 }
 0x19c   :  { %v469_v42 = vpop.permute.xlu1 %468 }
 0x19d   :  { %v479_v15 = vmul.f32 %v471_v57, %v469_v42  ;;  %v480_v30 = vmul.f32 %v472_v8, %v469_v42  ;;  %v481_v21 = vmul.f32 %v473_v7, %v469_v42  ;;  %v482_v2 = vmul.f32 %v474_v5, %v469_v42 }
 0x1e2   :  { %v357_v43 = vpop.permute.xlu0 %356 }
 0x1e3   :  { %v367_v40 = vmul.f32 %v359_v18, %v357_v43  ;;  %v368_v51 = vmul.f32 %v1079_v13, %v357_v43  ;;  %v369_v47 = vmul.f32 %v1080_v10, %v357_v43  ;;  %v370_v52 = vmul.f32 %v1081_v50, %v357_v43 }
 0x1e4   :  { %v528_v13 = vmul.f32 %v520_v0, %v520_v0  ;;  %v530_v10 = vmul.f32 %v522_v27, %v522_v27 }
 0x1e5   :  { %v375_v18 = vadd.f32 %v367_v40, %v347_v44  ;;  %v376_v38 = vadd.f32 %v368_v51, %v348_v39  ;;  %v377_v59 = vadd.f32 %v369_v47, %v349_v12  ;;  %v378_v31 = vadd.f32 %v370_v52, %v350_v9  ;;  %v497_v44 = vpop.permute.xlu1 %496 }
 0x1e6   :  { %v509_v57 = vmul.f32 %v501_v33, %v497_v44  ;;  %v510_v8 = vmul.f32 %v502_v25, %v497_v44  ;;  %v527_v40 = vmul.f32 %v519_v32, %v519_v32  ;;  %v529_v51 = vmul.f32 %v521_v54, %v521_v54 }
 0x1e7   :  { %v403_v60 = vadd.f32 %v395_v34, %v375_v18  ;;  %v404_v39 = vadd.f32 %v396_v28, %v376_v38  ;;  %v405_v11 = vadd.f32 %v397_v37, %v377_v59  ;;  %v406_v1 = vadd.f32 %v398_v29, %v378_v31 }
 0x1e8   :  { %v507_v29 = vmul.f32 %v499_v58, %v497_v44 }
 0x1e9   :  { %v431_v12 = vadd.f32 %v423_v63, %v403_v60  ;;  %v432_v14 = vadd.f32 %v424_v53, %v404_v39  ;;  %v433_v61 = vadd.f32 %v425_v49, %v405_v11  ;;  %v434_v9 = vadd.f32 %v426_v48, %v406_v1 }
 0x1ea   :  { %v508_v63 = vmul.f32 %v500_v35, %v497_v44 }
 0x1eb   :  { %v459_v3 = vadd.f32 %v451_v62, %v431_v12  ;;  %v460_v34 = vadd.f32 %v452_v22, %v432_v14  ;;  %v461_v28 = vadd.f32 %v453_v46, %v433_v61  ;;  %v462_v37 = vadd.f32 %v454_v56, %v434_v9 }
 0x1ed   :  { %v487_v53 = vadd.f32 %v479_v15, %v459_v3  ;;  %v488_v49 = vadd.f32 %v480_v30, %v460_v34  ;;  %v489_v7 = vadd.f32 %v481_v21, %v461_v28  ;;  %v490_v45 = vadd.f32 %v482_v2, %v462_v37 }
 0x1ef   :  { %v515_v20 = vadd.f32 %v507_v29, %v487_v53  ;;  %v516_v5 = vadd.f32 %v508_v63, %v488_v49  ;;  %v517_v42 = vadd.f32 %v509_v57, %v489_v7  ;;  %v518_v48 = vadd.f32 %v510_v8, %v490_v45 }
 0x1f1   :  { %v523_v58 = vmax.f32 %v515_v20, 0.0  ;;  %v524_v4 = vmax.f32 %v516_v5, 0.0  ;;  %v525_v16 = vmax.f32 %v517_v42, 0.0  ;;  %v526_v35 = vmax.f32 %v518_v48, 0.0 }
 0x1f3   :  { %v531_v17 = vmul.f32 %v523_v58, %v523_v58  ;;  %v532_v33 = vmul.f32 %v524_v4, %v524_v4  ;;  %v533_v25 = vmul.f32 %v525_v16, %v525_v16  ;;  %v534_v43 = vmul.f32 %v526_v35, %v526_v35 }
 0x1f4   :  { %v629_v16 = vlaneseq }
 0x1f5   :  { %v536_v47 = vsel %vm535_vm0, %v531_v17, 0.0  ;;  %v544_v50 = vsel %vm535_vm0, %v532_v33, 0.0  ;;  %v552_v52 = vsel %vm535_vm0, %v533_v25, 0.0  ;;  %v560_v55 = vsel %vm535_vm0, %v534_v43, 0.0 }
 0x1f6   :  { %v537_v41 = vadd.f32 %v536_v47, %v527_v40  ;;  %v545_v23 = vadd.f32 %v544_v50, %v528_v13  ;;  %v553_v36 = vadd.f32 %v552_v52, %v529_v51  ;;  %v561_v18 = vadd.f32 %v560_v55, %v530_v10 }
 0x1f7   :  { %vm631_vm11 = vcmp.lt.s32.totalorder %v629_v16, 512 }
 0x1f8   :  { %v538_v38 = vrot.slane %v537_v41, 4  ;;  %v546_v59 = vrot.slane %v545_v23, 4  ;;  %v554_v31 = vrot.slane %v553_v36, 4  ;;  %v562_v62 = vrot.slane %v561_v18, 4 }
 0x1fa   :  { %v539_v22 = vadd.f32 %v538_v38, %v537_v41  ;;  %v547_v46 = vadd.f32 %v546_v59, %v545_v23  ;;  %v555_v56 = vadd.f32 %v554_v31, %v553_v36  ;;  %v563_v60 = vadd.f32 %v562_v62, %v561_v18 }
 0x1fc   :  { %v540_v39 = vrot.slane %v539_v22, 2  ;;  %v548_v11 = vrot.slane %v547_v46, 2  ;;  %v556_v1 = vrot.slane %v555_v56, 2  ;;  %v564_v26 = vrot.slane %v563_v60, 2 }
 0x1fe   :  { %v541_v6 = vadd.f32 %v540_v39, %v539_v22  ;;  %v549_v24 = vadd.f32 %v548_v11, %v547_v46  ;;  %v557_v19 = vadd.f32 %v556_v1, %v555_v56  ;;  %v565_v44 = vadd.f32 %v564_v26, %v563_v60 }
 0x200   :  { %v542_v12 = vrot.slane %v541_v6, 1  ;;  %v550_v14 = vrot.slane %v549_v24, 1  ;;  %v558_v61 = vrot.slane %v557_v19, 1  ;;  %v566_v9 = vrot.slane %v565_v44, 1 }
 0x202   :  { %v543_v15 = vadd.f32 %v542_v12, %v541_v6  ;;  %v551_v30 = vadd.f32 %v550_v14, %v549_v24  ;;  %v559_v21 = vadd.f32 %v558_v61, %v557_v19  ;;  %v567_v2 = vadd.f32 %v566_v9, %v565_v44 }
 0x204   :  { %686 = vrsqrt.f32 %v543_v15  ;;  %vm575_vm2 = vcmp.eq.f32.partialorder %v543_v15, inf  ;;  %vm577_vm3 = vcmp.eq.f32.partialorder %v543_v15, 0.0  ;;  %v578_v17 = vand.u32 2147483648, %v543_v15 }
 0x205   :  { %688 = vrsqrt.f32 %v551_v30  ;;  %vm587_vm4 = vcmp.eq.f32.partialorder %v551_v30, inf  ;;  %vm589_vm5 = vcmp.eq.f32.partialorder %v551_v30, 0.0  ;;  %v590_v40 = vand.u32 2147483648, %v551_v30 }
 0x206   :  { %690 = vrsqrt.f32 %v559_v21  ;;  %vm599_vm6 = vcmp.eq.f32.partialorder %v559_v21, inf  ;;  %vm601_vm7 = vcmp.eq.f32.partialorder %v559_v21, 0.0  ;;  %v602_v47 = vand.u32 2147483648, %v559_v21 }
 0x207   :  { %692 = vrsqrt.f32 %v567_v2  ;;  %vm611_vm8 = vcmp.eq.f32.partialorder %v567_v2, inf  ;;  %v614_v41 = vand.u32 2147483648, %v567_v2  ;;  %vm613_vm9 = vcmp.eq.f32.partialorder %v567_v2, 0.0 }
 0x20a   :  { %v687_v3 = vpop.eup %686 }
 0x20b   :  { %v689_v34 = vpop.eup %688  ;;  %v569_v28 = vmul.f32 %v687_v3, %v543_v15 }
 0x20c   :  { %v691_v37 = vpop.eup %690  ;;  %v581_v29 = vmul.f32 %v689_v34, %v551_v30 }
 0x20d   :  { %v693_v63 = vpop.eup %692  ;;  %v570_v57 = vmul.f32 %v687_v3, %v569_v28  ;;  %v593_v8 = vmul.f32 %v691_v37, %v559_v21 }
 0x20e   :  { %v582_v53 = vmul.f32 %v689_v34, %v581_v29  ;;  %v605_v49 = vmul.f32 %v693_v63, %v567_v2 }
 0x20f   :  { %v571_v7 = vmul.f32 0.5, %v570_v57  ;;  %v594_v45 = vmul.f32 %v691_v37, %v593_v8 }
 0x210   :  { %v583_v20 = vmul.f32 0.5, %v582_v53  ;;  %v606_v5 = vmul.f32 %v693_v63, %v605_v49 }
 0x211   :  { %v572_v42 = vsub.f32 1.5, %v571_v7  ;;  %v595_v48 = vmul.f32 0.5, %v594_v45 }
 0x212   :  { %v584_v32 = vsub.f32 1.5, %v583_v20  ;;  %v607_v0 = vmul.f32 0.5, %v606_v5 }
 0x213   :  { %v573_v54 = vmul.f32 %v687_v3, %v572_v42  ;;  %v596_v27 = vsub.f32 1.5, %v595_v48 }
 0x214   :  { %v585_v58 = vmul.f32 %v689_v34, %v584_v32  ;;  %v608_v4 = vsub.f32 1.5, %v607_v0 }
 0x215   :  { %v574_v35 = vmul.f32 %v573_v54, %v543_v15  ;;  %v597_v33 = vmul.f32 %v691_v37, %v596_v27 }
 0x216   :  { %v586_v25 = vmul.f32 %v585_v58, %v551_v30  ;;  %v609_v43 = vmul.f32 %v693_v63, %v608_v4 }
 0x217   :  { %v598_v13 = vmul.f32 %v597_v33, %v559_v21  ;;  %v576_v51 = vsel %vm575_vm2, %v543_v15, %v574_v35 }
 0x218   :  { %v588_v10 = vsel %vm587_vm4, %v551_v30, %v586_v25  ;;  %v610_v50 = vmul.f32 %v609_v43, %v567_v2  ;;  %v579_v38 = vsel %vm577_vm3, %v578_v17, %v576_v51 }
 0x219   :  { %v591_v52 = vsel %vm589_vm5, %v590_v40, %v588_v10  ;;  %v600_v55 = vsel %vm599_vm6, %v559_v21, %v598_v13 }
 0x21a   :  { %v603_v23 = vsel %vm601_vm7, %v602_v47, %v600_v55  ;;  %v612_v36 = vsel %vm611_vm8, %v567_v2, %v610_v50  ;;  %v620_v18 = vrot.slane %v591_v52, 7 }
 0x21b   :  { %v615_v59 = vsel %vm613_vm9, %v614_v41, %v612_v36  ;;  %v621_v31 = vrot.slane %v603_v23, 6 }
 0x21c   :  { %v622_v62 = vrot.slane %v615_v59, 5  ;;  %v624_v22 = vsel %vm623_vm1, %v579_v38, %v620_v18 }
 0x21e   :  { %v626_v46 = vsel %vm625_vm10, %v621_v31, %v622_v62 }
 0x21f   :  { %v627_v56 = vsel %vm535_vm0, %v624_v22, %v626_v46 }
 0x220   :  { %633 = vst.msk [vmem:[#allocation5] sm:$0xf] %vm631_vm11, %v627_v56 }
 0x221   :  { %644 = dma.vmem_to_hbm [thread:$0]  %s640_s2, 64, %s642_s28, [#allocation4]  }
 0x222   :  { %744 = dma.done.wait [#allocation4], 64  }
 0x223   :  { %745 = vsyncadd [#allocation4], 4294967232 }
 0x224   :  { %649 = vsyncpa [#allocation3], 1 }
 0x225   :  { %650 = vsyncpa [#allocation4], 1 }

</bundles_post_ra>
